<compile_context>
chip_gen: v5e
topology: v5e:2x2
jax: 0.10.0
libtpu: 0.0.40
codegen_flags: <defaults>
</compile_context>

<pallas_src>
import functools
import math

import jax
import jax.numpy as jnp
import numpy as np
from jax import lax
from jax.experimental import pallas as pl
from jax.experimental.pallas import tpu as pltpu


# ---------------------------------------------------------------------------
# Hardware queries (generation-aware tiling).
# ---------------------------------------------------------------------------
def _tpu_vmem_bytes():
    try:
        return int(pltpu.get_tpu_info().vmem_capacity_bytes)
    except Exception:
        return 64 * 1024 * 1024            # conservative (v7x-sized) fallback


def _tpu_num_tensorcores():
    """>1 only on parts whose 'parallel' grid axes shard across TensorCores."""
    try:
        kind = jax.devices()[0].device_kind.lower()
    except Exception:
        return 1
    if ("v4" in kind) or ("v5p" in kind) or ("v7" in kind) or ("7x" in kind):
        return 2
    return 1


def _vmem_limit_bytes():
    # explicit scoped-VMEM limit (default is only 16/32 MiB); stay well under
    # physical VMEM on every generation.
    return int(min(_tpu_vmem_bytes() // 2, 96 * 1024 * 1024))


# ---------------------------------------------------------------------------
# pltpu.roll sign-convention probe (conv shifts correct on any jax version).
# ---------------------------------------------------------------------------
def _roll_probe_kernel(x_ref, o_ref):
    o_ref[...] = pltpu.roll(x_ref[...], shift=1, axis=1)


def _detect_roll_sign():
    """Returns r with pltpu.roll(x, r*s, axis)[..., i] == x[..., (i+s) % n]."""
    x = jnp.broadcast_to(jnp.arange(128, dtype=jnp.float32), (8, 128))
    y = pl.pallas_call(
        _roll_probe_kernel,
        out_shape=jax.ShapeDtypeStruct((8, 128), jnp.float32),
    )(x)
    return 1 if float(y[0, 0]) == 1.0 else -1


def _full_spec(a):
    ndim = a.ndim
    return pl.BlockSpec(tuple(a.shape), lambda i, _n=ndim: (0,) * _n)


# ---------------------------------------------------------------------------
# Kernel 1: fused SA/Epi cross-attention transformer block.
#   tok_ref : (c, Mt) lane-dense token block, Mt = Nt * L (rows 0..c/2 = SA,
#             rows c/2..c = EPI).  o_ref: same layout; EPI half passed through.
# ---------------------------------------------------------------------------
def _epi_token_kernel(tok_ref, wsa_ref, wepi_ref, ln_ref, wqkv_ref, wo_ref,
                      w1_ref, w2_ref, wout_ref, o_ref, *, L, num_heads):
    f32 = jnp.float32
    c, Mt = tok_ref.shape
    c2 = c // 2
    e = wsa_ref.shape[0]
    hd = e // num_heads
    Nt = Mt // L

    tok = tok_ref[...]
    sa = tok[0:c2, :]                       # (c2, Mt)
    epi = tok[c2:c, :]                      # (c2, Mt)

    ln = ln_ref[...]                        # (e, 6) columns: sa_g,sa_b,epi_g,...
    w_sa = wsa_ref[...]                     # (e, c2)
    w_epi = wepi_ref[...]                   # (e, c2)
    in_proj = wqkv_ref[...]                 # (3e, e)
    w_o = wo_ref[...]                       # (e, e)
    w1 = w1_ref[...]                        # (2e, e)
    w2 = w2_ref[...]                        # (e, 2e)
    w_out = wout_ref[...]                   # (c2, e)

    def vpu_mm(wm, xm):
        # (e_out, e_in) @ (e_in, Mt) with e_in <= ~16: VPU broadcast FMAs over
        # lane-dense rows; avoids K=2..16 MXU matmuls entirely.
        e_in = xm.shape[0]
        acc = wm[:, 0:1] * xm[0:1, :]
        for i in range(1, e_in):
            acc = acc + wm[:, i:i + 1] * xm[i:i + 1, :]
        return acc

    def layer_norm(xm, g_col, b_col):
        # normalize over the feature (sublane) axis.
        mu = jnp.mean(xm, axis=0, keepdims=True)
        d = xm - mu
        var = jnp.mean(d * d, axis=0, keepdims=True)
        return d * lax.rsqrt(var + 1e-5) * g_col + b_col

    # linear_in (bias free)
    sa_p = vpu_mm(w_sa, sa)                 # (e, Mt)
    epi_p = vpu_mm(w_epi, epi)              # (e, Mt)
    sa_n = layer_norm(sa_p, ln[:, 0:1], ln[:, 1:2])
    epi_n = layer_norm(epi_p, ln[:, 2:3], ln[:, 3:4])

    # q <- epi_norm, k <- sa_norm, v <- sa (un-normed); single full-width
    # projections (no per-head projection matmuls).
    q = vpu_mm(in_proj[0:e, :], epi_n)      # (e, Mt)
    k = vpu_mm(in_proj[e:2 * e, :], sa_n)
    v = vpu_mm(in_proj[2 * e:3 * e, :], sa_p)

    # token-major views for the batched attention core (2-D transposes only).
    q_t = q.T.reshape(Nt, L, e)
    k_t = k.T.reshape(Nt, L, e)
    v_t = v.T.reshape(Nt, L, e)

    # NOTE: operands kept f32 (bf16 casts were evaluated but dropped to keep the
    # 2e-2 validation margin; these K=4 / K=L matmuls are not the bottleneck).
    scale = 1.0 / math.sqrt(hd)
    ctxs = []
    for h_i in range(num_heads):
        lo, hi = h_i * hd, (h_i + 1) * hd
        s = jnp.einsum('nqd,nkd->nqk', q_t[:, :, lo:hi], k_t[:, :, lo:hi],
                       preferred_element_type=jnp.float32) * scale
        s = s - jnp.max(s, axis=-1, keepdims=True)
        p = jnp.exp(s)
        p = p * pl.reciprocal(jnp.sum(p, axis=-1, keepdims=True), approx=True)
        ctx = jnp.einsum('nqk,nkd->nqd', p, v_t[:, :, lo:hi],
                         preferred_element_type=jnp.float32)    # (Nt, L, hd)
        ctxs.append(ctx.reshape(Mt, hd))
    ctx_all = jnp.concatenate(ctxs, axis=1).T                   # (e, Mt)
    attn = vpu_mm(w_o, ctx_all)                                 # out_proj

    sa_t = attn + sa_p
    # TODO(synk): Dropout layers are identity (inference / p == 0 semantics).
    ff = layer_norm(sa_t, ln[:, 4:5], ln[:, 5:6])
    ff = jnp.maximum(vpu_mm(w1, ff), 0.0)
    ff = vpu_mm(w2, ff)
    sa_t = sa_t + ff

    out_sa = vpu_mm(w_out, sa_t)                                # (c2, Mt)
    o_ref[...] = jnp.concatenate([out_sa, epi], axis=0).astype(o_ref.dtype)


def _choose_token_tile(N, L, c, e, budget, cores):
    """Largest Nt (divisor of N, Nt*L % 128 == 0 or Nt == N) fitting `budget`;
    keep >= `cores` grid steps only on multi-TensorCore parts."""
    def legal(d):
        return (d * L) % 128 == 0 or d == N

    def est(d):
        mt = d * L
        io = 2 * 2 * c * mt * 4                     # in/out blocks, 2x buffered
        act = mt * 4 * (2 * c + 12 * e)             # f32 activations
        att = d * L * L * 4 * 3                     # scores / probs / context
        return io + act + att

    divs = [d for d in range(1, N + 1) if N % d == 0 and legal(d)] or [N]
    fitting = [d for d in divs if est(d) <= budget]
    nt = max(fitting) if fitting else min(divs)
    if cores > 1 and fitting:
        multi = [d for d in fitting if N // d >= cores]
        if multi:
            nt = max(multi)
    return nt


def _epi_token_pallas(tok, prep, num_heads):
    """tok: (c, N, L) token array.  Returns same layout, SA half transformed,
    EPI half passed through."""
    c, N, L = tok.shape
    e = prep['w_sa'].shape[0]
    vmem_limit = _vmem_limit_bytes()
    cores = _tpu_num_tensorcores()
    Nt = _choose_token_tile(N, L, c, e, vmem_limit // 2, cores)
    Mt = Nt * L
    M = N * L
    grid = (N // Nt,)

    kernel = functools.partial(_epi_token_kernel, L=L, num_heads=num_heads)
    out = pl.pallas_call(
        kernel,
        out_shape=jax.ShapeDtypeStruct((c, M), tok.dtype),
        grid_spec=pltpu.PrefetchScalarGridSpec(
            num_scalar_prefetch=0,
            grid=grid,
            in_specs=[pl.BlockSpec((c, Mt), lambda i: (0, i))] +
                     [_full_spec(prep[k]) for k in
                      ('w_sa', 'w_epi', 'ln', 'in_proj', 'w_o',
                       'w_ff1', 'w_ff2', 'w_out')],
            out_specs=pl.BlockSpec((c, Mt), lambda i: (0, i)),
        ),
        compiler_params=pltpu.CompilerParams(
            dimension_semantics=("parallel",),
            vmem_limit_bytes=vmem_limit),
    )(tok.reshape(c, M), prep['w_sa'], prep['w_epi'], prep['ln'],
      prep['in_proj'], prep['w_o'], prep['w_ff1'], prep['w_ff2'],
      prep['w_out'])
    return out.reshape(c, N, L)


# ---------------------------------------------------------------------------
# Kernel 2: fused conv_1 stack (3x Conv3d(1,3,3), LeakyReLU(0.2) between) plus
# the outer residual add, on channel-major (C, Bt, HW) blocks.
# ---------------------------------------------------------------------------
def _conv3_residual_kernel(w_ref, x_ref, sc_ref, o_ref, *, C, H, W, n_layers,
                           roll_sign):
    """w_ref : flat (n_layers*C*C*9,) f32 SMEM [layer, co, ci, kh, kw].
    x_ref / sc_ref / o_ref : (C, Bt, H*W) f32 blocks; channel planes are
    leading-axis slabs (clean (8,128) tiles).
    TODO(synk): for C >= ~8 switch the C_in contraction to a bf16 MXU matmul
    over the stacked 9*C_in taps, and run the plane arithmetic in bf16 on
    v6e/v7x; at C = 4 the VPU broadcast-FMA path below is the right regime."""
    HW = H * W
    idx = lax.broadcasted_iota(jnp.int32, (1, HW), 1)
    row = idx // W
    col = idx - row * W

    taps = []
    for kh in range(3):
        dh = kh - 1
        for kw in range(3):
            dw = kw - 1
            conds = []
            if dh < 0:
                conds.append(row >= -dh)
            elif dh > 0:
                conds.append(row < H - dh)
            if dw < 0:
                conds.append(col >= -dw)
            elif dw > 0:
                conds.append(col < W - dw)
            valid = None
            for cnd in conds:
                valid = cnd if valid is None else jnp.logical_and(valid, cnd)
            amt = (roll_sign * (dh * W + dw)) % HW
            taps.append((kh, kw, amt, valid))

    planes = [x_ref[ci] for ci in range(C)]          # each (Bt, HW)
    for layer in range(n_layers):
        acc = [None] * C
        for kh, kw, amt, valid in taps:
            shifted = []
            for ci in range(C):
                pln = planes[ci]
                if amt != 0:
                    pln = pltpu.roll(pln, shift=amt, axis=1)
                if valid is not None:
                    pln = jnp.where(valid, pln, 0.0)
                shifted.append(pln)
            for co in range(C):
                a = acc[co]
                for ci in range(C):
                    wv = w_ref[((layer * C + co) * C + ci) * 9 + kh * 3 + kw]
                    t = wv * shifted[ci]
                    a = t if a is None else a + t
                acc[co] = a
        if layer < n_layers - 1:
            planes = [jnp.where(a > 0, a, 0.2 * a) for a in acc]   # LeakyReLU
        else:
            planes = acc

    for co in range(C):
        o_ref[co] = (planes[co] + sc_ref[co]).astype(o_ref.dtype)


def _choose_conv_tile(B, C, HW, budget, cores):
    def est(bt):
        io = 3 * 2 * C * bt * HW * 4          # x / shortcut / out, 2x buffered
        work = 3 * C * bt * HW * 4            # planes + acc + shifted temps
        return io + work

    cands = [d for d in range(1, B + 1)
             if B % d == 0 and (d % 8 == 0 or d == B)]
    fitting = [d for d in cands if est(d) <= budget]
    bt = max(fitting) if fitting else min(cands)
    if cores > 1 and fitting:
        multi = [d for d in fitting if B // d >= cores]
        if multi:
            bt = max(multi)
    return bt


def _conv1_residual_pallas(x, sc, w_flat, roll_sign, H, W):
    """conv_1(x) + sc for x / sc in channel-major (C, B, H*W) layout."""
    C, B, HW = x.shape
    n_layers = int(w_flat.shape[0]) // (C * C * 9)
    vmem_limit = _vmem_limit_bytes()
    cores = _tpu_num_tensorcores()
    Bt = _choose_conv_tile(B, C, HW, vmem_limit // 2, cores)
    grid = (B // Bt,)

    kernel = functools.partial(_conv3_residual_kernel, C=C, H=H, W=W,
                               n_layers=n_layers, roll_sign=roll_sign)
    return pl.pallas_call(
        kernel,
        out_shape=jax.ShapeDtypeStruct((C, B, HW), x.dtype),
        grid_spec=pltpu.PrefetchScalarGridSpec(
            num_scalar_prefetch=0,
            grid=grid,
            in_specs=[
                pl.BlockSpec(memory_space=pltpu.MemorySpace.SMEM),   # weights
                pl.BlockSpec((C, Bt, HW), lambda i: (0, i, 0)),      # input
                pl.BlockSpec((C, Bt, HW), lambda i: (0, i, 0)),      # residual
            ],
            out_specs=pl.BlockSpec((C, Bt, HW), lambda i: (0, i, 0)),
        ),
        compiler_params=pltpu.CompilerParams(
            dimension_semantics=("parallel",),
            vmem_limit_bytes=vmem_limit),
    )(w_flat, x, sc)


# ---------------------------------------------------------------------------
# Full SA_Epi_Trans forward (layout glue reduced to one transpose per side).
# ---------------------------------------------------------------------------
def sa_epi_trans_forward(x, prep, angRes, num_heads, roll_sign):
    b, c, n, h, w = x.shape
    u = v = angRes
    assert n == u * v
    hw = h * w
    x6 = x.reshape(b, c, u, v, h, w)
    # conv-layout residual, reused by both conv calls.
    sc = jnp.transpose(x, (1, 0, 2, 3, 4)).reshape(c, b * n, hw)

    # ---- round 1: tokens sequence over (u,h), batch over (b,v,w) (EPI view) --
    tok = jnp.transpose(x6, (1, 0, 3, 5, 2, 4)).reshape(c, b * v * w, u * h)
    tok = _epi_token_pallas(tok, prep, num_heads)
    t6 = tok.reshape(c, b, v, w, u, h)
    conv_in = jnp.transpose(t6, (0, 1, 4, 2, 5, 3)).reshape(c, b * n, hw)
    buf = _conv1_residual_pallas(conv_in, sc, prep['conv_w_flat'],
                                 roll_sign, h, w)

    # ---- round 2: tokens sequence over (v,w), batch over (b,u,h) -------------
    buf6 = buf.reshape(c, b, u, v, h, w)
    tok = jnp.transpose(buf6, (0, 1, 2, 4, 3, 5)).reshape(c, b * u * h, v * w)
    tok = _epi_token_pallas(tok, prep, num_heads)
    t6 = tok.reshape(c, b, u, h, v, w)
    conv_in = jnp.transpose(t6, (0, 1, 2, 4, 3, 5)).reshape(c, b * n, hw)
    out = _conv1_residual_pallas(conv_in, sc, prep['conv_w_flat'],
                                 roll_sign, h, w)

    return jnp.transpose(out.reshape(c, b, n, h, w), (1, 0, 2, 3, 4))


def prepare_params(params):
    """Weight preprocessing hoisted out of the per-call wrappers (done once)."""
    ln = jnp.stack([params['sa_g'], params['sa_b'], params['epi_g'],
                    params['epi_b'], params['ff_g'], params['ff_b']],
                   axis=1)                                  # (e, 6) columns
    return {
        'w_sa': params['w_sa_in'],        # (e, c2)   used as (out, in)
        'w_epi': params['w_epi_in'],      # (e, c2)
        'ln': ln,
        'in_proj': params['in_proj'],     # (3e, e)
        'w_o': params['w_o'],             # (e, e)
        'w_ff1': params['w_ff1'],         # (2e, e)
        'w_ff2': params['w_ff2'],         # (e, 2e)
        'w_out': params['w_out'],         # (c2, e)
        'conv_w_flat': params['conv_w'].reshape(-1),
    }


def init_params(key, channels):
    c = channels
    c2 = c // 2
    e = 2 * c                       # emb_dim = channels * 2 (see SA_Epi_Trans)
    ks = jax.random.split(key, 8)

    def unif(k, shape, fan_in):
        bnd = 1.0 / np.sqrt(fan_in)
        return jax.random.uniform(k, shape, jnp.float32, -bnd, bnd)

    ones = lambda m: jnp.ones((m,), jnp.float32)
    zeros = lambda m: jnp.zeros((m,), jnp.float32)
    return {
        'w_sa_in': unif(ks[0], (e, c2), c2),       # Linear(c/2 -> e), no bias
        'w_epi_in': unif(ks[1], (e, c2), c2),
        'sa_g': ones(e), 'sa_b': zeros(e),
        'epi_g': ones(e), 'epi_b': zeros(e),
        'in_proj': unif(ks[2], (3 * e, e), e),     # MHA in_proj_weight
        'w_o': unif(ks[3], (e, e), e),             # MHA out_proj.weight
        'ff_g': ones(e), 'ff_b': zeros(e),
        'w_ff1': unif(ks[4], (2 * e, e), e),
        'w_ff2': unif(ks[5], (e, 2 * e), 2 * e),
        'w_out': unif(ks[6], (c2, e), e),          # linear_out
        'conv_w': unif(ks[7], (3, c, c, 3, 3), c * 9),   # three Conv3d, no bias
    }


# ---------------------------------------------------------------------------
# Plain-JAX reference (mirrors the PyTorch module) for the correctness check.
# ---------------------------------------------------------------------------
def _reference_forward(x, prm, angRes, num_heads):
    HIGH = lax.Precision.HIGHEST

    def ln(y, g, beta):
        mu = y.mean(-1, keepdims=True)
        var = ((y - mu) ** 2).mean(-1, keepdims=True)
        return (y - mu) / jnp.sqrt(var + 1e-5) * g + beta

    def mm(a, b_):
        return jnp.matmul(a, b_, precision=HIGH)

    def epi_trans(buffer):
        b, c, u, v, h, w = buffer.shape
        c2 = c // 2
        e = prm['w_sa_in'].shape[0]
        hd = e // num_heads
        L, N = v * w, b * u * h
        tok = jnp.transpose(buffer, (3, 5, 0, 2, 4, 1)).reshape(L, N, c)
        sa, epi = tok[:, :, :c2], tok[:, :, c2:]
        sa_p = mm(sa, prm['w_sa_in'].T)
        epi_p = mm(epi, prm['w_epi_in'].T)
        sa_n = ln(sa_p, prm['sa_g'], prm['sa_b'])
        epi_n = ln(epi_p, prm['epi_g'], prm['epi_b'])
        wq, wk, wv = prm['in_proj'][:e], prm['in_proj'][e:2 * e], prm['in_proj'][2 * e:]
        q, k, vv = mm(epi_n, wq.T), mm(sa_n, wk.T), mm(sa_p, wv.T)

        def split(z):
            return z.reshape(L, N, num_heads, hd).transpose(1, 2, 0, 3).reshape(
                N * num_heads, L, hd)

        qh, kh_, vh = split(q), split(k), split(vv)
        scores = mm(qh, jnp.swapaxes(kh_, 1, 2)) / math.sqrt(hd)
        pr = jax.nn.softmax(scores, axis=-1)
        oh = mm(pr, vh)
        o = oh.reshape(N, num_heads, L, hd).transpose(2, 0, 1, 3).reshape(L, N, e)
        o = mm(o, prm['w_o'].T)
        sa_t = o + sa_p
        ff = ln(sa_t, prm['ff_g'], prm['ff_b'])
        ff = mm(jnp.maximum(mm(ff, prm['w_ff1'].T), 0.0), prm['w_ff2'].T)
        sa_t = sa_t + ff
        out_sa = mm(sa_t, prm['w_out'].T)
        tok_out = jnp.concatenate([out_sa, epi], axis=-1)
        return jnp.transpose(tok_out.reshape(v, w, b, u, h, c), (2, 5, 3, 0, 4, 1))

    def conv1(y):
        b, c, n, h, w = y.shape
        z = jnp.transpose(y, (0, 2, 1, 3, 4)).reshape(b * n, c, h, w)

        def c2d(z_, w_):
            return lax.conv_general_dilated(
                z_, w_, (1, 1), ((1, 1), (1, 1)),
                dimension_numbers=("NCHW", "OIHW", "NCHW"), precision=HIGH)

        z = c2d(z, prm['conv_w'][0]); z = jnp.where(z > 0, z, 0.2 * z)
        z = c2d(z, prm['conv_w'][1]); z = jnp.where(z > 0, z, 0.2 * z)
        z = c2d(z, prm['conv_w'][2])
        return jnp.transpose(z.reshape(b, n, c, h, w), (0, 2, 1, 3, 4))

    b, c, n, h, w = x.shape
    u = v = angRes
    shortcut = x
    buf = jnp.transpose(x.reshape(b, c, u, v, h, w), (0, 1, 3, 2, 5, 4))
    buf = conv1(jnp.transpose(epi_trans(buf), (0, 1, 3, 2, 5, 4)).reshape(
        b, c, n, h, w)) + shortcut
    buf = buf.reshape(b, c, u, v, h, w)
    buf = conv1(epi_trans(buf).reshape(b, c, n, h, w)) + shortcut
    return buf


if __name__ == "__main__":
    roll_sign = _detect_roll_sign()

    key = jax.random.PRNGKey(0)
    k_in, k_p = jax.random.split(key)

    b, c, ang_res, h, w = 2, 4, 2, 16, 16
    n = ang_res * ang_res
    num_heads = 2            # MHSA_params = {'num_heads': 2, 'dropout': 0.0}

    x = jax.random.normal(k_in, (b, c, n, h, w), dtype=jnp.float32)
    params = init_params(k_p, c)
    prep = prepare_params(params)

    fwd = jax.jit(functools.partial(sa_epi_trans_forward, angRes=ang_res,
                                    num_heads=num_heads, roll_sign=roll_sign))
    out = jax.block_until_ready(fwd(x, prep))
    assert out.shape == (b, c, n, h, w)

    ref = jax.block_until_ready(_reference_forward(x, params, ang_res, num_heads))
    np.testing.assert_allclose(np.asarray(out), np.asarray(ref),
                               rtol=2e-2, atol=2e-2)
    print("KERNEL_OK")
</pallas_src>

<mosaic_0001>
module attributes {stable_mosaic.version = 11 : i64} {
  func.func @_roll_probe_kernel(%arg0: memref<8x128xf32, #tpu.memory_space<vmem>>, %arg1: memref<8x128xf32, #tpu.memory_space<vmem>>) attributes {dimension_semantics = [], scalar_prefetch = 0 : i64, scratch_operands = 0 : i64, tpu.core_type = #tpu.core_type<tc>} {
    %c0 = arith.constant 0 : index
    %c0_0 = arith.constant 0 : index
    %0 = vector.load %arg0[%c0, %c0_0] : memref<8x128xf32, #tpu.memory_space<vmem>>, vector<8x128xf32>
    %c1_i32 = arith.constant 1 : i32
    %1 = tpu.dynamic_rotate %0 by %c1_i32 dim 1 : vector<8x128xf32>, i32 -> vector<8x128xf32>
    %c0_1 = arith.constant 0 : index
    %c0_2 = arith.constant 0 : index
    %2 = vector.load %arg1[%c0_1, %c0_2] : memref<8x128xf32, #tpu.memory_space<vmem>>, vector<8x128xf32>
    tpu.vector_store %arg1[%c0_1, %c0_2], %1 {strides = array<i32>} : memref<8x128xf32, #tpu.memory_space<vmem>>, vector<8x128xf32>,
    return
  }
}

</mosaic_0001>

<bundles_post_ra>
// kernel: tpu_custom_call.1
= control target key start
LH: loop header
LB: loop body
LE: loop exit
PB: predicated region body
PF: predicated region fallthrough
CT: control target
= control target key end

     0   :  { %6 = vsyncpa [#allocation3], 0  ;;  %s118_s0 = inlined_call_operand.hbm [shape: f32[8,128], index: 0, kind: input, shape index: {}]   ;;  %s119_s1 = inlined_call_operand.hbm [shape: f32[8,128], index: 1, kind: output, shape index: {}]  }
   0x1   :  { %7 = vsyncpa [#allocation4], 0  ;;  %s13_s8 = sshll.u32 %s118_s0, 4  ;;  %s99_s9 = smov [#allocation2]   ;;  %s14_s8 = int_to_ptr.hbm [resolvable:$true] %s13_s8 }
   0x2   :  { %s15_s10 = sshll.u32 %s99_s9, 4  ;;  %s16_s10 = int_to_ptr.vmem [resolvable:$true] %s15_s10 }
   0x3   :  { %18 = dma.hbm_to_vmem [thread:$0]  %s14_s8, 128, %s16_s10, [#allocation3]  }
   0x4   :  { %95 = dma.done.wait [#allocation3], 128  }
   0x5   :  { %96 = vsyncadd [#allocation3], 4294967168  ;;  %v23_v0 = vld [vmem:[#allocation2] sm:$0xff]  ;;  %s100_s11 = smov 1   ;;  %s101_s12 = smov [#allocation5]  }
   0x6   :  { %24 = vrot.lane.b32.xlu0 %v23_v0, %s100_s11  ;;  %s32_s13 = sshll.u32 %s101_s12, 4  ;;  %s34_s16 = sshll.u32 %s119_s1, 4  ;;  %s33_s13 = int_to_ptr.vmem [resolvable:$true] %s32_s13  ;;  %s35_s16 = int_to_ptr.hbm [resolvable:$true] %s34_s16 }
  0x78   :  { %v25_v1 = vpop.permute.xlu0 %24 }
  0x79   :  { %26 = vst [vmem:[#allocation5] sm:$0xff] %v25_v1 }
  0x7a   :  { %37 = dma.vmem_to_hbm [thread:$0]  %s33_s13, 128, %s35_s16, [#allocation4]  }
  0x7b   :  { %97 = dma.done.wait [#allocation4], 128  }
  0x7c   :  { %98 = vsyncadd [#allocation4], 4294967168 }
  0x7d   :  { %42 = vsyncpa [#allocation3], 1 }
  0x7e   :  { %43 = vsyncpa [#allocation4], 1 }

</bundles_post_ra>
